<compile_context>
chip_gen: v5e
topology: v5e:2x2
jax: 0.10.0
libtpu: 0.0.40
codegen_flags: <defaults>
</compile_context>

<pallas_src>
import jax
import jax.numpy as jnp
from jax import lax
from jax.experimental import pallas as pl
from jax.experimental.pallas import tpu as pltpu


# VMEM budgeting (review): size tiles against a budget that is safe on every
# current chip (v7x: 64 MiB physical / ~32 MiB scoped default; v5e/v6e: 128 MiB
# physical, v5e scoped default only 16 MiB).
_VMEM_TILE_BUDGET = 32 * 1024 * 1024   # double-buffered (input + output) tiles
_VMEM_LIMIT_BYTES = 48 * 1024 * 1024   # explicit scoped limit, < v7x physical
_TARGET_STEP_BYTES = 2 * 1024 * 1024   # aim for ~2 MiB of HBM traffic per step
_MAX_IMAGES_PER_STEP = 16              # static-unroll cap inside the kernel


def _round_up(x, m):
    return -(-x // m) * m


def _conv_relu_kernel(w_ref, x_ref, o_ref):
    # w_ref : (C_out, C_in)     resident pointwise weight (native PyTorch order)
    # x_ref : (NB, C_in, T)     NB images x channels x flattened-spatial tile
    # o_ref : (NB, C_out, T)    output tile, lane-dense minor dim
    w = w_ref[...]
    # Static unroll over the (small, capped) per-step image batch: each image
    # is one lane-dense (C_out,C_in)x(C_in,T) MXU matmul with f32 accumulation
    # (preferred_element_type), ReLU fused right before the store.  This avoids
    # the (o,b,t)->(b,o,t) relayout an einsum formulation would need.
    for b in range(x_ref.shape[0]):
        y = jnp.dot(w, x_ref[b], preferred_element_type=jnp.float32)
        o_ref[b] = jnp.maximum(y, 0.0).astype(o_ref.dtype)


def conv_relu(x_nchw, weight):
    """
    x_nchw : (N, C_in, H, W)        input, PyTorch NCHW layout
    weight : (C_out, C_in, KH, KW)  Conv2d weight, bias=False
    returns: (N, C_out, H, W)       relu(conv1x1(x))
    """
    N, C_in, H, W = x_nchw.shape
    C_out, C_in_w, KH, KW = weight.shape
    assert C_in_w == C_in, "channel mismatch"
    if KH != 1 or KW != 1:
        # TODO(synk): general kernel_size>1 path (module default is kernel=1).
        raise NotImplementedError("only kernel_size=1 is implemented")

    dtype = x_nchw.dtype
    dtype_bytes = jnp.dtype(dtype).itemsize
    HW = H * W

    # --- flatten spatial; pad the lane axis to a multiple of 128 so stores are
    #     unmasked full-width vst (review item).  No-op when already aligned. --
    x3 = x_nchw.reshape(N, C_in, HW)
    HW_p = _round_up(HW, 128)
    if HW_p != HW:
        x3 = jnp.pad(x3, ((0, 0), (0, 0), (0, HW_p - HW)))

    # Cast the weight once in the wrapper so the MXU operands match dtypes
    # (no per-grid-step promote of a mixed f32/bf16 dot) (review item).
    w2 = weight.reshape(C_out, C_in).astype(dtype)

    # --- spatial tile T from the VMEM budget, not a magic constant -----------
    # 2x = double buffering of the per-image (input + output) tile.
    per_lane_bytes = (C_in + C_out) * dtype_bytes
    t_budget = _VMEM_TILE_BUDGET // (2 * per_lane_bytes)
    t_budget = max(128, (t_budget // 512) * 512)     # keep a 512-lane multiple
    T = min(HW_p, t_budget)

    # --- images per grid step: amortize the ~0.35 us fixed step overhead when
    #     HW is small, within the same VMEM budget and an unroll cap. ---------
    per_image_step_bytes = per_lane_bytes * T
    NB = max(1, _TARGET_STEP_BYTES // per_image_step_bytes)
    NB = min(NB, N, _MAX_IMAGES_PER_STEP,
             max(1, _VMEM_TILE_BUDGET // (2 * per_image_step_bytes)))

    # Guarantee >= 2 total grid steps whenever possible so both of v7x's
    # TensorCores get sharded work (review item).
    s_blocks = pl.cdiv(HW_p, T)
    if s_blocks * pl.cdiv(N, NB) < 2:
        if N >= 2:
            NB = max(1, (N + 1) // 2)
        elif HW_p >= 256:
            T = max(128, (HW_p // 2 // 128) * 128)
            s_blocks = pl.cdiv(HW_p, T)

    # Pad the batch so NB divides it (no-op in the common case).
    N_p = _round_up(N, NB)
    if N_p != N:
        x3 = jnp.pad(x3, ((0, N_p - N), (0, 0), (0, 0)))

    grid = (N_p // NB, s_blocks)

    out3 = pl.pallas_call(
        _conv_relu_kernel,
        out_shape=jax.ShapeDtypeStruct((N_p, C_out, HW_p), dtype),
        grid_spec=pltpu.PrefetchScalarGridSpec(
            num_scalar_prefetch=0,
            grid=grid,
            in_specs=[
                # Resident weight: constant index_map -> fetched once, reused.
                pl.BlockSpec((C_out, C_in), lambda n, t: (0, 0)),
                pl.BlockSpec((NB, C_in, T), lambda n, t: (n, 0, t)),
            ],
            out_specs=pl.BlockSpec((NB, C_out, T), lambda n, t: (n, 0, t)),
        ),
        compiler_params=pltpu.CompilerParams(
            dimension_semantics=("parallel", "parallel"),
            vmem_limit_bytes=_VMEM_LIMIT_BYTES),
    )(w2, x3)

    if N_p != N or HW_p != HW:
        out3 = out3[:N, :, :HW]
    return out3.reshape(N, C_out, H, W)      # free reshape back to NCHW


def _reference(x_nchw, weight):
    # Pure-JAX reference: 1x1 conv (no bias) + ReLU, matching nn.Conv2d + nn.ReLU.
    z = lax.conv_general_dilated(
        x_nchw, weight, window_strides=(1, 1), padding="VALID",
        dimension_numbers=("NCHW", "OIHW", "NCHW"))
    return jnp.maximum(z, 0.0)


if __name__ == "__main__":
    key = jax.random.PRNGKey(0)
    k_x, k_w = jax.random.split(key, 2)

    N, C_in, C_out, H, W = 2, 4, 8, 16, 16   # C_out != C_in exercises the
                                             # non-square pointwise path

    x = jax.random.normal(k_x, (N, C_in, H, W), dtype=jnp.float32)
    w = jax.random.normal(k_w, (C_out, C_in, 1, 1), dtype=jnp.float32) * 0.1

    out = jax.block_until_ready(conv_relu(x, w))
    ref = jax.block_until_ready(_reference(x, w))

    assert out.shape == (N, C_out, H, W), out.shape
    assert bool(jnp.all(out >= 0.0)), "ReLU not applied"
    assert jnp.allclose(out, ref, atol=1e-5, rtol=1e-5), "mismatch vs reference"

    print("KERNEL_OK")
</pallas_src>

<mosaic_0001>
module attributes {stable_mosaic.version = 11 : i64} {
  func.func @_conv_relu_kernel(%arg0: i32, %arg1: i32, %arg2: memref<8x4xf32, #tpu.memory_space<vmem>>, %arg3: memref<1x4x256xf32, #tpu.memory_space<vmem>>, %arg4: memref<1x8x256xf32, #tpu.memory_space<vmem>>) attributes {dimension_semantics = [#tpu.dimension_semantics<parallel>, #tpu.dimension_semantics<parallel>], iteration_bounds = array<i64: 2, 1>, scalar_prefetch = 0 : i64, scratch_operands = 0 : i64, tpu.core_type = #tpu.core_type<tc>, window_params = [{pipeline_mode = #tpu.pipeline_mode<synchronous>, transform_indices = @transform_0, window_bounds = array<i64: 8, 4>}, {transform_indices = @transform_1, window_bounds = array<i64: 1, 4, 256>}, {transform_indices = @transform_2, window_bounds = array<i64: 1, 8, 256>}]} {
    %c0 = arith.constant 0 : index
    %c0_0 = arith.constant 0 : index
    %0 = vector.load %arg2[%c0, %c0_0] : memref<8x4xf32, #tpu.memory_space<vmem>>, vector<8x4xf32>
    %c0_1 = arith.constant 0 : index
    %c0_2 = arith.constant 0 : index
    %c0_3 = arith.constant 0 : index
    %1 = vector.load %arg3[%c0_1, %c0_2, %c0_3] : memref<1x4x256xf32, #tpu.memory_space<vmem>>, vector<1x4x256xf32>
    %2 = vector.shape_cast %1 : vector<1x4x256xf32> to vector<4x256xf32>
    %cst = arith.constant dense<0.000000e+00> : vector<8x256xf32>
    %3 = tpu.matmul %0, %2, %cst {dimension_numbers = #tpu.dot_dimension_numbers<[1], [0], [0], [1], [0, 0, 1, 1], [], []>} : vector<8x4xf32>, vector<4x256xf32>, vector<8x256xf32> -> vector<8x256xf32>
    %cst_4 = arith.constant 0.000000e+00 : f32
    %4 = vector.broadcast %cst_4 : f32 to vector<8x256xf32>
    %5 = arith.maximumf %3, %4 : vector<8x256xf32>
    %c0_5 = arith.constant 0 : index
    %c0_6 = arith.constant 0 : index
    %c0_7 = arith.constant 0 : index
    %6 = vector.load %arg4[%c0_5, %c0_6, %c0_7] : memref<1x8x256xf32, #tpu.memory_space<vmem>>, vector<1x8x256xf32>
    %7 = vector.shape_cast %6 : vector<1x8x256xf32> to vector<8x256xf32>
    %8 = vector.shape_cast %5 : vector<8x256xf32> to vector<1x8x256xf32>
    tpu.vector_store %arg4[%c0_5, %c0_6, %c0_7], %8 {strides = array<i32>} : memref<1x8x256xf32, #tpu.memory_space<vmem>>, vector<1x8x256xf32>,
    return
  }
  func.func @transform_0(%arg0: i32, %arg1: i32) -> (i32, i32) {
    %c0_i32 = arith.constant 0 : i32
    %c0_i32_0 = arith.constant 0 : i32
    %c0_i32_1 = arith.constant 0 : i32
    return %c0_i32, %c0_i32_0 : i32, i32
  }
  func.func @transform_1(%arg0: i32, %arg1: i32) -> (i32, i32, i32) {
    %c0_i32 = arith.constant 0 : i32
    %c0_i32_0 = arith.constant 0 : i32
    return %arg0, %c0_i32, %arg1 : i32, i32, i32
  }
  func.func @transform_2(%arg0: i32, %arg1: i32) -> (i32, i32, i32) {
    %c0_i32 = arith.constant 0 : i32
    %c0_i32_0 = arith.constant 0 : i32
    return %arg0, %c0_i32, %arg1 : i32, i32, i32
  }
}

</mosaic_0001>

<bundles_post_ra>
// kernel: tpu_custom_call.1
= control target key start
LH: loop header
LB: loop body
LE: loop exit
PB: predicated region body
PF: predicated region fallthrough
CT: control target
= control target key end

     0   :  { %7 = vsyncpa [#allocation3], 0  ;;  %s680_s0 = inlined_call_operand.vmem [shape: f32[8,4], index: 0, kind: input, shape index: {}]   ;;  %s681_s1 = inlined_call_operand.hbm [shape: f32[2,4,256], index: 1, kind: input, shape index: {}]   ;;  %s682_s2 = inlined_call_operand.hbm [shape: f32[2,8,256], index: 2, kind: output, shape index: {}]  }
   0x1   :  { %9 = vsyncpa [#allocation3 + $0x1], 0 }
   0x2   :  { %10 = vsyncpa [#allocation4], 0 }
   0x3   :  { %12 = vsyncpa [#allocation4 + $0x1], 0  ;;  %s556_s9 = smov 0   ;;  %s558_s10 = smov 0  }
   0x4   :  { %s560_s11 = smov 0   ;;  %s562_s12 = smov 0  }
   0x5   :  { %s564_s13 = smov 0   ;;  %s566_s14 = smov 0  }
   0x6 LB: > { %s344_s15 = sadd.s32 4294967295, %s539_s14   ;;  %s345_s16 = sadd.s32 4294967294, %s539_s14   ;;  %s539_s14 = sphi %s566_s14, %s18_s14   ;;  %s535_s13 = sphi %s564_s13, %s691_s13   ;;  %s531_s12 = sphi %s562_s12, %s690_s12   ;;  %s527_s11 = sphi %s560_s11, %s689_s11   ;;  %s523_s10 = sphi %s558_s10, %s688_s10   ;;  %s519_s9 = sphi %s556_s9, %s687_s9  }
   0x7   : > { %s30_s17 = sadd.s32 1, %s535_s13  ;;  %s60_s18 = sadd.s32 1, %s527_s11 }
   0x8   : > { %p32_p0 = scmp.ge.s32.totalorder %s30_s17, 2  ;;  %p67_p1 = scmp.ne.s32.totalorder %s527_s11, %s523_s10 }
   0x9   : > { %p68_p2 = scmp.eq.s32.totalorder %s539_s14, 0  ;;  %p73_p3 = scmp.ne.s32.totalorder %s523_s10, %s519_s9 }
   0xa   : > { %s693_s17 = smov (%p32_p0, %s30_s17), 0  ;;  %p74_p5 = scmp.eq.s32.totalorder %s344_s15, 0 }
   0xb   : > { %p597_p4 = por %p68_p2, %p67_p1  ;;  %s55_s20 = ssub.s32 %s535_s13, %s693_s17 }
   0xc   : > { %p99_p6 = scmp.eq.s32.totalorder %s344_s15, 1  ;;  %p58_p7 = scmp.eq.s32.totalorder %s55_s20, 0 }
   0xd   : > { %p603_p8 = por %p74_p5, %p73_p3  ;;  %p105_p10 = scmp.eq.s32.totalorder %s345_s16, 1 }
   0xe   : > { %p607_p9 = por %p99_p6, %p67_p1  ;;  %p347_p12 = scmp.ge.s32.totalorder %s539_s14, 2 }
   0xf   : > { %s612_s23 = scalar_select %p58_p7, %s527_s11, %s60_s18  }
  0x10   : > { %p614_p11 = por %p105_p10, %p73_p3  ;;  %p377_p13 = scmp.lt.s32.totalorder %s539_s14, 2 }
  0x11   : > { %s128_s25 = sand.u32 1, %s527_s11   ;;  %s363_s27 = sshll.u32 %s535_s13, 3 }
  0x12   : > { %s348_s26 = sshll.u32 %s128_s25, 3  ;;  %s139_s30 = scalar_lea.hbm %s681_s1, %s363_s27 }
  0x13   : > { %s132_s3 = scalar_lea.vmem [#allocation2], %s348_s26  ;;  %s141_s5 = sshll.u32 %s139_s30, 4  ;;  %s142_s5 = int_to_ptr.hbm [resolvable:$true] %s141_s5 }
  0x14   : > { %s143_s4 = sshll.u32 %s132_s3, 4  ;;  %p370_p0 = pnand %p377_p13, %p597_p4  ;;  %s144_s4 = int_to_ptr.vmem [resolvable:$true] %s143_s4 }
  0x15   : > { %p351_p1 = scmp.ge.s32.totalorder %s539_s14, 1  ;;  %p148_p2 = scmp.lt.s32.totalorder %s539_s14, 3 }
  0x16   : > { %s129_s6 = scalar_lea.sflag [#allocation3], %s128_s25 }
  0x17   : > { %372 = dma.hbm_to_vmem [thread:$0]  (!%p370_p0), %s142_s5, 128, %s144_s4, %s129_s6  }
  0x18   : > { %p149_p3 = pnand %p351_p1, %p148_p2 }
  0x19   : > { %s630_s7 = sand.u32 (!%p149_p3), 1, %s523_s10  }
  0x1a   : > { %152 = sbr.rel (%p149_p3) target bundleno = 174 (0xae), region = 28  ;;  %s352_s8 = sshll.u32 (!%p149_p3), %s630_s7, 3 }
  0x1b   : > { %s155_s15 = scalar_lea.sflag (!%p149_p3), [#allocation3], %s630_s7  ;;  %s158_s16 = scalar_lea.vmem (!%p149_p3), [#allocation2], %s352_s8 }
  0x1f   : > { %510 = dma.done.wait (%p603_p8), %s155_s15, 128  }
  0x20   : > { %512 = vsyncadd (%p603_p8), %s155_s15, 4294967168  ;;  %v183_v0 = vld [vmem:[%s158_s16] sm:$0xff]  ;;  %vm192_vm0 = vcmask 1043456   ;;  %v182_v1 = vld [vmem:[%s680_s0] sm:$0xff]  ;;  %vm188_vm1 = vcmask 31744   ;;  %s353_s20 = sshll.u32 %s630_s7, 4 }
  0x21   : > { %185 = vst [vmem:[#allocation1] ss:$2 sm:$0xff] %v183_v0  ;;  %s364_s21 = sshll.u32 %s531_s12, 4  ;;  %s179_s28 = scalar_lea.vmem [#allocation5], %s353_s20 }
  0x22   : > { %s255_s27 = scalar_lea.hbm %s682_s2, %s364_s21  ;;  %s257_s29 = sshll.u32 %s179_s28, 4  ;;  %s258_s29 = int_to_ptr.vmem [resolvable:$true] %s257_s29 }
  0x23   : > { %s259_s30 = sshll.u32 %s255_s27, 4  ;;  %s242_s3 = scalar_lea.sflag [#allocation4], %s630_s7  ;;  %s260_s30 = int_to_ptr.hbm [resolvable:$true] %s259_s30 }
  0x24   : > { %s471_s4 = sshra.s32 %s260_s30, 4  ;;  %s477_s8 = scalar_lea.hbm %s682_s2, 32  ;;  %s472_s4 = int_to_ptr.hbm [resolvable:$true] %s471_s4 }
  0x25   : > { %s473_s12 = scalar_lea.hbm %s472_s4, 16  ;;  %p478_p7 = scmp.lt.s32.totalorder %s472_s4, %s682_s2 }
  0x26   : > { %p474_p4 = scmp.ne.s32.totalorder %s472_s4, %s473_s12  ;;  %p479_p8 = scmp.lt.s32.totalorder %s477_s8, %s473_s12 }
  0x28   : > { %v186_v2 = vld.sshfl [vmem:[#allocation1] sm:$0xff pattern:$0x75316420]  ;;  %v187_v3 = vld.sshfl [vmem:[#allocation1 + $0x8] sm:$0xff pattern:$0x75316420]  ;;  %p475_p5 = pnand %p474_p4, %p607_p9  ;;  %p480_p10 = por %p479_p8, %p478_p7 }
  0x29   : > { %354 = vmatpush.msk.msra.mxu0 %vm192_vm0, %v186_v2  ;;  %356 = vmatpush.msk.msra.mxu1 %vm192_vm0, %v187_v3 }
  0x2a   : > { %355 = vmatmul.msk.f32.vlgmr.msra.gmra.mxu0 %vm188_vm1, %v182_v1  ;;  %357 = vmatmul.msk.f32.vlgmr.msra.gmra.mxu1 %vm188_vm1, %v182_v1  ;;  %p476_p6 = pneg %p475_p5 }
  0x2c   : > { %p481_p13 = pnand %p480_p10, %p476_p6 }
  0xa7   : > { %v214_v4 = vpop.f32.mrf.mxu0  ;;  %v234_v5 = vpop.f32.mrf.mxu1 }
  0xa8   : > { %v237_v6 = vmax.f32 %v214_v4, 0.0  ;;  %v238_v7 = vmax.f32 %v234_v5, 0.0 }
  0xaa   : > { %239 = vst [vmem:[%s179_s28] sm:$0xff] %v237_v6 }
  0xab   : > { %240 = vst [vmem:[%s179_s28 + $0x8] sm:$0xff] %v238_v7 }
  0xac   : > { %484 = shalt.err (!%p481_p13)
}
  0xad   : > { %367 = dma.vmem_to_hbm [thread:$0]  (%p607_p9), %s258_s29, 256, %s260_s30, %s242_s3  }
  0xae PF: > { %s271_s7 = sand.u32 1, %s519_s9   ;;  %p374_p0 = pnand %p347_p12, %p614_p11 }
  0xaf   : > { %s272_s18 = scalar_lea.sflag [#allocation4], %s271_s7 }
  0xb0   : > { %p375_p1 = pneg %p374_p0 }
  0xb2   : > { %514 = dma.done.wait (%p375_p1), %s272_s18, 256  }
  0xb3   : > { %516 = vsyncadd (%p375_p1), %s272_s18, 4294967040  ;;  %s18_s14 = sadd.s32 1, %s539_s14   ;;  %s687_s9 = smov %s523_s10 }
  0xb4   : > { %p15_p2 = scmp.ge.s32.totalorder %s18_s14, 4   ;;  %s688_s10 = smov %s527_s11 }
  0xb5   : > { %s689_s11 = smov %s612_s23  ;;  %s690_s12 = smov %s535_s13 }
  0xb6   : > { %s691_s13 = smov %s693_s17  ;;  %17 = sbr.rel (!%p15_p2) target bundleno = 6 (0x6), region = 73 }
  0xbb   :  { %278 = vsyncpa [#allocation3], 1 }
  0xbc   :  { %280 = vsyncpa [#allocation3 + $0x1], 1 }
  0xbd   :  { %281 = vsyncpa [#allocation4], 1 }
  0xbe   :  { %283 = vsyncpa [#allocation4 + $0x1], 1 }

</bundles_post_ra>
